<compile_context>
chip_gen: v5e
topology: v5e:2x2
jax: 0.10.0
libtpu: 0.0.40
codegen_flags: <defaults>
</compile_context>

<pallas_src>
import functools

import jax
import jax.numpy as jnp
from jax.experimental import pallas as pl
from jax.experimental.pallas import tpu as pltpu

K_IN = 8          # fc1 input features
PACK = 128 // K_IN  # 16 original rows packed per 128-lane row


def _fused_packed_kernel(x_ref, w_ref, b_ref, o_ref):
    # One lane-dense MXU pass: o = x_packed @ W_blockdiag + b_tiled (f32 acc).
    o_ref[...] = (
        jnp.dot(x_ref[...], w_ref[...], preferred_element_type=jnp.float32)
        + b_ref[...]
    ).astype(o_ref.dtype)


def _round_up(n: int, m: int) -> int:
    return ((n + m - 1) // m) * m


def mlp_forward(x, fc1_w, fc1_b, fc2_w, fc2_b, *, tm_packed=2048):
    """Forward pass of `net` (fc2(fc1(x))) as a single lane-packed Pallas kernel.

    x:     (B, 8)  f32
    fc1_w: (4, 8)  PyTorch layout (out, in);  fc1_b: (4,)
    fc2_w: (C, 4)  PyTorch layout;            fc2_b: (C,)
    returns (B, C) f32
    """
    B = x.shape[0]
    C = fc2_w.shape[0]
    if B == 0:
        return jnp.zeros((0, C), jnp.float32)

    # ---- Algebraic fusion of the two linears (exact, f32) -------------------
    #   fc2(fc1(x)) = x @ (W1^T @ W2^T) + (b1 @ W2^T + b2)
    w1 = fc1_w.T.astype(jnp.float32)                                   # (8, 4)
    w2 = fc2_w.T.astype(jnp.float32)                                   # (4, C)
    W = jnp.dot(w1, w2, preferred_element_type=jnp.float32)            # (8, C)
    b = (
        jnp.dot(fc1_b.astype(jnp.float32), w2,
                preferred_element_type=jnp.float32)
        + fc2_b.astype(jnp.float32)
    )                                                                  # (C,)

    # ---- Lane packing: block-diagonal weight & tiled bias --------------------
    # W_big[8r + k, C*r + c] = W[k, c];  b_big[0, C*r + c] = b[c]
    eye = jnp.eye(PACK, dtype=jnp.float32)
    W_big = jnp.einsum("kc,rs->rksc", W, eye).reshape(PACK * K_IN, PACK * C)
    b_big = jnp.tile(b.reshape(1, C), (1, PACK))                       # (1, 16C)

    # ---- Pack the batch: (B, 8) -> (n_rows, 128) -----------------------------
    # Bp multiple of 128 => packed row count is a multiple of 8 (sublane
    # aligned); pad is skipped when B already is a multiple of 128.
    Bp = _round_up(B, PACK * 8)
    if Bp != B:
        x = jnp.pad(x, ((0, Bp - B), (0, 0)))
    n_rows = Bp // PACK
    xp = x.reshape(n_rows, PACK * K_IN)        # free, contiguous reshape

    # ---- Tile choice: big tiles, but >= 2 grid steps for v7x megacore --------
    half = _round_up(pl.cdiv(n_rows, 2), 8)
    tm_eff = max(8, min(tm_packed, half))
    grid = (pl.cdiv(n_rows, tm_eff),)

    cost = pl.CostEstimate(
        flops=2 * n_rows * (PACK * K_IN) * (PACK * C),
        transcendentals=0,
        bytes_accessed=(n_rows * PACK * K_IN + n_rows * PACK * C
                        + PACK * K_IN * PACK * C + PACK * C) * 4,
    )

    out = pl.pallas_call(
        _fused_packed_kernel,
        out_shape=jax.ShapeDtypeStruct((n_rows, PACK * C), jnp.float32),
        grid=grid,
        in_specs=[
            pl.BlockSpec((tm_eff, PACK * K_IN), lambda i: (i, 0)),   # x: streamed
            pl.BlockSpec((PACK * K_IN, PACK * C), lambda i: (0, 0)),  # W: resident
            pl.BlockSpec((1, PACK * C), lambda i: (0, 0)),            # b: resident
        ],
        out_specs=pl.BlockSpec((tm_eff, PACK * C), lambda i: (i, 0)),
        compiler_params=pltpu.CompilerParams(
            dimension_semantics=("parallel",),   # v7x: shard batch over both TCs
        ),
        cost_estimate=cost,
    )(xp, W_big, b_big)

    out = out.reshape(Bp, C)                    # free, contiguous reshape
    return out if Bp == B else out[:B]


def init_params(key, num_class=10):
    # Deterministic synthetic parameters with the same shapes/layout as the
    # PyTorch module (nn.Linear: weight (out, in), bias (out,)).
    k1, k2, k3, k4 = jax.random.split(key, 4)
    fc1_w = jax.random.normal(k1, (4, 8), dtype=jnp.float32) * 0.1
    fc1_b = jax.random.normal(k2, (4,), dtype=jnp.float32) * 0.1
    fc2_w = jax.random.normal(k3, (num_class, 4), dtype=jnp.float32) * 0.1
    fc2_b = jax.random.normal(k4, (num_class,), dtype=jnp.float32) * 0.1
    return fc1_w, fc1_b, fc2_w, fc2_b


if __name__ == "__main__":
    key = jax.random.PRNGKey(0)
    kx, kp, kx2, kx3 = jax.random.split(key, 4)

    num_class = 10
    fc1_w, fc1_b, fc2_w, fc2_b = init_params(kp, num_class)

    # Weight fusion + packing + pallas_call all live in one jit.
    fwd = jax.jit(functools.partial(mlp_forward), static_argnames=("tm_packed",))

    def ref_forward(xx):
        # Pure-JAX reference matching PyTorch semantics: (x @ W.T + b) per layer.
        return (xx @ fc1_w.T + fc1_b) @ fc2_w.T + fc2_b

    # Small batch: exercises the pad-to-128 + single grid step path.
    B = 8
    x = jax.random.normal(kx, (B, 8), dtype=jnp.float32)
    out = jax.block_until_ready(fwd(x, fc1_w, fc1_b, fc2_w, fc2_b))
    assert out.shape == (B, num_class)
    assert jnp.allclose(out, ref_forward(x), atol=1e-5, rtol=1e-5)

    # Non-multiple batch: exercises padding + multi-step grid + ragged tail.
    B2 = 1000
    x2 = jax.random.normal(kx2, (B2, 8), dtype=jnp.float32)
    out2 = jax.block_until_ready(fwd(x2, fc1_w, fc1_b, fc2_w, fc2_b))
    assert out2.shape == (B2, num_class)
    assert jnp.allclose(out2, ref_forward(x2), atol=1e-5, rtol=1e-5)

    # Multiple-of-128 batch: exercises the fully copy-free (no pad/slice) path.
    B3 = 512
    x3 = jax.random.normal(kx3, (B3, 8), dtype=jnp.float32)
    out3 = jax.block_until_ready(fwd(x3, fc1_w, fc1_b, fc2_w, fc2_b))
    assert out3.shape == (B3, num_class)
    assert jnp.allclose(out3, ref_forward(x3), atol=1e-5, rtol=1e-5)

    print("KERNEL_OK")
</pallas_src>

<mosaic_0001>
module attributes {stable_mosaic.version = 11 : i64} {
  func.func @_fused_packed_kernel(%arg0: i32, %arg1: memref<8x128xf32, #tpu.memory_space<vmem>>, %arg2: memref<128x160xf32, #tpu.memory_space<vmem>>, %arg3: memref<1x160xf32, #tpu.memory_space<vmem>>, %arg4: memref<8x160xf32, #tpu.memory_space<vmem>>) attributes {dimension_semantics = [#tpu.dimension_semantics<parallel>], iteration_bounds = array<i64: 1>, scalar_prefetch = 0 : i64, scratch_operands = 0 : i64, tpu.core_type = #tpu.core_type<tc>, window_params = [{transform_indices = @transform_0, window_bounds = array<i64: 8, 128>}, {pipeline_mode = #tpu.pipeline_mode<synchronous>, transform_indices = @transform_1, window_bounds = array<i64: 128, 160>}, {pipeline_mode = #tpu.pipeline_mode<synchronous>, transform_indices = @transform_2, window_bounds = array<i64: 1, 160>}, {transform_indices = @transform_3, window_bounds = array<i64: 8, 160>}]} {
    %c0 = arith.constant 0 : index
    %c0_0 = arith.constant 0 : index
    %0 = vector.load %arg1[%c0, %c0_0] : memref<8x128xf32, #tpu.memory_space<vmem>>, vector<8x128xf32>
    %c0_1 = arith.constant 0 : index
    %c0_2 = arith.constant 0 : index
    %1 = vector.load %arg2[%c0_1, %c0_2] : memref<128x160xf32, #tpu.memory_space<vmem>>, vector<128x160xf32>
    %cst = arith.constant dense<0.000000e+00> : vector<8x160xf32>
    %2 = tpu.matmul %0, %1, %cst {dimension_numbers = #tpu.dot_dimension_numbers<[1], [0], [0], [1], [0, 0, 1, 1], [], []>} : vector<8x128xf32>, vector<128x160xf32>, vector<8x160xf32> -> vector<8x160xf32>
    %c0_3 = arith.constant 0 : index
    %c0_4 = arith.constant 0 : index
    %3 = vector.load %arg3[%c0_3, %c0_4] : memref<1x160xf32, #tpu.memory_space<vmem>>, vector<1x160xf32>
    %4 = vector.broadcast %3 : vector<1x160xf32> to vector<8x160xf32>
    %5 = arith.addf %2, %4 : vector<8x160xf32>
    %c0_5 = arith.constant 0 : index
    %c0_6 = arith.constant 0 : index
    %6 = vector.load %arg4[%c0_5, %c0_6] : memref<8x160xf32, #tpu.memory_space<vmem>>, vector<8x160xf32>
    tpu.vector_store %arg4[%c0_5, %c0_6], %5 {strides = array<i32>} : memref<8x160xf32, #tpu.memory_space<vmem>>, vector<8x160xf32>,
    return
  }
  func.func @transform_0(%arg0: i32) -> (i32, i32) {
    %c0_i32 = arith.constant 0 : i32
    %c0_i32_0 = arith.constant 0 : i32
    return %arg0, %c0_i32 : i32, i32
  }
  func.func @transform_1(%arg0: i32) -> (i32, i32) {
    %c0_i32 = arith.constant 0 : i32
    %c0_i32_0 = arith.constant 0 : i32
    %c0_i32_1 = arith.constant 0 : i32
    return %c0_i32, %c0_i32_0 : i32, i32
  }
  func.func @transform_2(%arg0: i32) -> (i32, i32) {
    %c0_i32 = arith.constant 0 : i32
    %c0_i32_0 = arith.constant 0 : i32
    %c0_i32_1 = arith.constant 0 : i32
    return %c0_i32, %c0_i32_0 : i32, i32
  }
  func.func @transform_3(%arg0: i32) -> (i32, i32) {
    %c0_i32 = arith.constant 0 : i32
    %c0_i32_0 = arith.constant 0 : i32
    return %arg0, %c0_i32 : i32, i32
  }
}

</mosaic_0001>

<bundles_post_ra>
// kernel: mlp_forward.1
= control target key start
LH: loop header
LB: loop body
LE: loop exit
PB: predicated region body
PF: predicated region fallthrough
CT: control target
= control target key end

     0   :  { %vm94_vm0 = vcmask 261120   ;;  %s228_s1 = inlined_call_operand.vmem [shape: f32[128,160], index: 1, kind: input, shape index: {}]   ;;  %s229_s0 = inlined_call_operand.vmem [shape: f32[8,128], index: 0, kind: input, shape index: {}]   ;;  %s230_s2 = inlined_call_operand.vmem [shape: f32[1,160], index: 2, kind: input, shape index: {}]   ;;  %s231_s3 = inlined_call_operand.vmem [shape: f32[8,160], index: 3, kind: output, shape index: {}]  }
   0x1   :  { %v45_v0 = vld [vmem:[%s228_s1 + $0xf0] sm:$0xff]  ;;  %v46_v1 = vld [vmem:[%s228_s1 + $0xf8] sm:$0xff]  ;;  %v43_v2 = vld [vmem:[%s228_s1 + $0xe0] sm:$0xff] }
   0x2   :  { %53 = vmatpush.msra.mxu0 %v45_v0  ;;  %73 = vmatpush.msra.mxu1 %v46_v1  ;;  %v44_v3 = vld [vmem:[%s228_s1 + $0xe8] sm:$0xff]  ;;  %v41_v4 = vld [vmem:[%s228_s1 + $0xd0] sm:$0xff]  ;;  %v42_v5 = vld [vmem:[%s228_s1 + $0xd8] sm:$0xff] }
   0x3   :  { %v39_v6 = vld [vmem:[%s228_s1 + $0xc0] sm:$0xff]  ;;  %v40_v7 = vld [vmem:[%s228_s1 + $0xc8] sm:$0xff]  ;;  %v37_v8 = vld [vmem:[%s228_s1 + $0xb0] sm:$0xff] }
   0x4   :  { %54 = vmatpush.msra.mxu0 %v43_v2  ;;  %74 = vmatpush.msra.mxu1 %v44_v3  ;;  %v38_v9 = vld [vmem:[%s228_s1 + $0xb8] sm:$0xff]  ;;  %v35_v10 = vld [vmem:[%s228_s1 + $0xa0] sm:$0xff]  ;;  %v36_v11 = vld [vmem:[%s228_s1 + $0xa8] sm:$0xff] }
   0x5   :  { %v33_v12 = vld [vmem:[%s228_s1 + $0x90] sm:$0xff]  ;;  %v34_v13 = vld [vmem:[%s228_s1 + $0x98] sm:$0xff]  ;;  %v31_v14 = vld [vmem:[%s228_s1 + $0x80] sm:$0xff] }
   0x6   :  { %55 = vmatpush.msra.mxu0 %v41_v4  ;;  %75 = vmatpush.msra.mxu1 %v42_v5  ;;  %v32_v15 = vld [vmem:[%s228_s1 + $0x88] sm:$0xff]  ;;  %v29_v16 = vld [vmem:[%s228_s1 + $0x70] sm:$0xff]  ;;  %v30_v17 = vld [vmem:[%s228_s1 + $0x78] sm:$0xff] }
   0x7   :  { %v27_v18 = vld [vmem:[%s228_s1 + $0x60] sm:$0xff]  ;;  %v28_v19 = vld [vmem:[%s228_s1 + $0x68] sm:$0xff]  ;;  %v25_v20 = vld [vmem:[%s228_s1 + $0x50] sm:$0xff] }
   0x8   :  { %56 = vmatpush.msra.mxu0 %v39_v6  ;;  %76 = vmatpush.msra.mxu1 %v40_v7  ;;  %v26_v21 = vld [vmem:[%s228_s1 + $0x58] sm:$0xff]  ;;  %v23_v22 = vld [vmem:[%s228_s1 + $0x40] sm:$0xff]  ;;  %v24_v23 = vld [vmem:[%s228_s1 + $0x48] sm:$0xff] }
   0x9   :  { %v21_v24 = vld [vmem:[%s228_s1 + $0x30] sm:$0xff]  ;;  %v22_v25 = vld [vmem:[%s228_s1 + $0x38] sm:$0xff]  ;;  %v19_v26 = vld [vmem:[%s228_s1 + $0x20] sm:$0xff] }
   0xa   :  { %57 = vmatpush.msra.mxu0 %v37_v8  ;;  %77 = vmatpush.msra.mxu1 %v38_v9  ;;  %v20_v27 = vld [vmem:[%s228_s1 + $0x28] sm:$0xff]  ;;  %v17_v28 = vld [vmem:[%s228_s1 + $0x10] sm:$0xff]  ;;  %v18_v29 = vld [vmem:[%s228_s1 + $0x18] sm:$0xff] }
   0xb   :  { %v15_v30 = vld [vmem:[%s228_s1] sm:$0xff]  ;;  %v16_v31 = vld [vmem:[%s228_s1 + $0x8] sm:$0xff] }
   0xc   :  { %58 = vmatpush.msra.mxu0 %v35_v10  ;;  %78 = vmatpush.msra.mxu1 %v36_v11  ;;  %v14_v32 = vld [vmem:[%s229_s0] sm:$0xff] }
   0xd   :  { %v47_v33 = vld [vmem:[%s230_s2] sm:$0x3] }
   0xe   :  { %59 = vmatpush.msra.mxu0 %v33_v12  ;;  %79 = vmatpush.msra.mxu1 %v34_v13  ;;  %v49_v34 = vperm.slane %v47_v33, 0  ;;  %v50_v35 = vperm.slane %v47_v33, 1 }
  0x10   :  { %60 = vmatpush.msra.mxu0 %v31_v14  ;;  %80 = vmatpush.msra.mxu1 %v32_v15 }
  0x12   :  { %61 = vmatpush.msra.mxu0 %v29_v16  ;;  %81 = vmatpush.msra.mxu1 %v30_v17 }
  0x14   :  { %62 = vmatpush.msra.mxu0 %v27_v18  ;;  %82 = vmatpush.msra.mxu1 %v28_v19 }
  0x16   :  { %63 = vmatpush.msra.mxu0 %v25_v20  ;;  %83 = vmatpush.msra.mxu1 %v26_v21 }
  0x18   :  { %64 = vmatpush.msra.mxu0 %v23_v22  ;;  %84 = vmatpush.msra.mxu1 %v24_v23 }
  0x1a   :  { %65 = vmatpush.msra.mxu0 %v21_v24  ;;  %85 = vmatpush.msra.mxu1 %v22_v25 }
  0x1c   :  { %66 = vmatpush.msra.mxu0 %v19_v26  ;;  %86 = vmatpush.msra.mxu1 %v20_v27 }
  0x1e   :  { %67 = vmatpush.msra.mxu0 %v17_v28  ;;  %87 = vmatpush.msra.mxu1 %v18_v29 }
  0x20   :  { %68 = vmatpush.msra.mxu0 %v15_v30  ;;  %88 = vmatpush.msra.mxu1 %v16_v31 }
  0x21   :  { %69 = vmatmul.f32.vlgmr.msra.gmra.mxu0 %v14_v32  ;;  %89 = vmatmul.f32.vlgmr.msra.gmra.mxu1 %v14_v32 }
  0x9e   :  { %v70_v36 = vpop.f32.mrf.mxu0  ;;  %v90_v37 = vpop.f32.mrf.mxu1 }
  0x9f   :  { %v71_v38 = vadd.f32 %v70_v36, %v49_v34  ;;  %v91_v39 = vadd.f32 %v90_v37, %v50_v35 }
  0xa1   :  { %93 = vst [vmem:[%s231_s3] sm:$0xff] %v71_v38 }
  0xa2   :  { %95 = vst.msk [vmem:[%s231_s3 + $0x8] sm:$0xff] %vm94_vm0, %v91_v39 }

</bundles_post_ra>
